<compile_context>
chip_gen: v6e
topology: v6e:2x2x1
jax: 0.10.0
libtpu: 0.0.40
codegen_flags: <defaults>
</compile_context>

<pallas_src>
import functools
import math

import jax
import jax.numpy as jnp
from jax.experimental import pallas as pl
from jax.experimental.pallas import tpu as pltpu


def _vmem_specs(n):
    return [pl.BlockSpec(memory_space=pltpu.MemorySpace.VMEM) for _ in range(n)]


def calc_coeff(iter_num, high=1.0, low=0.0, alpha=10.0, max_iter=10000.0):
    return float(2.0 * (high - low) / (1.0 + math.exp(-alpha * iter_num / max_iter))
                 - (high - low) + low)


# For production v6e/v7x shapes set this to jnp.bfloat16 to double MXU
# throughput and halve weight/activation DMA bytes (accumulation stays f32 via
# preferred_element_type).  Kept f32 here so the toy forward matches the
# PyTorch reference numerics exactly.
MXU_DTYPE = jnp.float32


def _mxu_dot(a, b):
    return jnp.dot(a.astype(MXU_DTYPE), b.astype(MXU_DTYPE),
                   preferred_element_type=jnp.float32)


# ----------------------------------------------------------------------------
# Fused DEAL forward kernel.
#   encoder:     feat   = relu(x @ W1 + b1)          (online_encoder)
#                logits = feat @ W2 + b2             (predict(readout(feat)))
#   softmax/entropy, CDAN outer-product ad-net, entropy-weighted BCE transfer
#   loss and source cross-entropy loss all computed in-register.
# The only HBM writes are the two (1,1) final loss scalars (unavoidable return
# values); every intermediate stays on-chip.
# ----------------------------------------------------------------------------
def _deal_fused_kernel(x_ref, labels_ref,
                       ew1_ref, eb1_ref, ew2_ref, eb2_ref,
                       aw1_ref, ab1_ref, aw2_ref, ab2_ref,
                       tloss_ref, closs_ref,
                       *, num_src, num_classes):
    # ----- encoder, once on the concatenated [source; target] batch ---------
    x = x_ref[...]                                                   # [B, Din]
    feat = jnp.maximum(_mxu_dot(x, ew1_ref[...]) + eb1_ref[...], 0.0)   # [B, F]
    logits = _mxu_dot(feat, ew2_ref[...]) + eb2_ref[...]                # [B, C]
    batch = feat.shape[0]
    half = batch // 2

    # ----- softmax(dim=1) + entropy ------------------------------------------
    m = jnp.max(logits, axis=-1, keepdims=True)
    e = jnp.exp(logits - m)
    denom = jnp.sum(e, axis=-1, keepdims=True)
    p = e / denom                                                     # [B, C]
    entropy = -jnp.sum(p * jnp.log(p + 1e-5), axis=-1, keepdims=True)  # [B, 1]

    # ----- CDAN ad-net: op[b, i*F + j] = softmax[b, i] * feat[b, j] ----------
    # Flattened outer product (torch.bmm + view) built in-register as C
    # lane-aligned [B, F] slabs concatenated along lanes, then ONE MXU
    # contraction with K = C*F (no per-class tiny matmuls).
    op = jnp.concatenate([p[:, i:i + 1] * feat for i in range(num_classes)],
                         axis=1)                                      # [B, C*F]
    ah = jnp.maximum(_mxu_dot(op, aw1_ref[...]) + ab1_ref[...], 0.0)  # [B, H]
    ad_logits = _mxu_dot(ah, aw2_ref[...]) + ab2_ref[...]             # [B, 1]

    # ----- CDAN entropy-weighted BCE (from logits) ---------------------------
    rows = jax.lax.broadcasted_iota(jnp.int32, (batch, 1), 0)
    dc_target = (rows < num_src).astype(jnp.float32)   # 1 on source rows
    src_mask = (rows < half).astype(jnp.float32)
    w_ent = 1.0 + jnp.exp(-entropy)
    sw = w_ent * src_mask
    tw = w_ent * (1.0 - src_mask)
    sw_sum = jnp.sum(sw, axis=(0, 1), keepdims=True)   # assumes both halves
    tw_sum = jnp.sum(tw, axis=(0, 1), keepdims=True)   # are non-empty
    weight = sw / sw_sum + tw / tw_sum
    # BCE(sigmoid(z), t) = softplus(z) - t*z  (exact, no log of saturated sigmoid)
    softplus = jnp.maximum(ad_logits, 0.0) + jnp.log(1.0 + jnp.exp(-jnp.abs(ad_logits)))
    bce = softplus - dc_target * ad_logits
    num = jnp.sum(weight * bce, axis=(0, 1), keepdims=True)
    den = jnp.sum(weight, axis=(0, 1), keepdims=True)
    tloss_ref[...] = num / den

    # ----- CrossEntropyLoss(mean) on the source logits -----------------------
    labels = labels_ref[...]                           # [B, 1] int32 (targets padded 0)
    cols = jax.lax.broadcasted_iota(jnp.int32, logits.shape, 1)
    onehot = (cols == labels).astype(jnp.float32)
    lse = m + jnp.log(denom)                           # reuse softmax max / partition
    nll = lse - jnp.sum(logits * onehot, axis=-1, keepdims=True)      # [B, 1]
    closs_ref[...] = (jnp.sum(nll * dc_target, axis=(0, 1), keepdims=True)
                      / float(num_src))


# ----------------------------------------------------------------------------
# DEAL.forward
# ----------------------------------------------------------------------------
def deal_forward(params, source_x, source_y, target_x, iter_num):
    # calc_coeff(i) only scales the (backward-only) gradient-reversal hook.
    _ = calc_coeff(iter_num)
    enc, ad = params["encoder"], params["ad_net"]
    ns, nt = source_x.shape[0], target_x.shape[0]

    # Concatenate the RAW inputs only (encoder then runs once in-kernel; no
    # feature/logit concat of kernel outputs through HBM anymore).
    x_cat = jnp.concatenate([source_x, target_x], axis=0)
    labels = jnp.pad(source_y.astype(jnp.int32), (0, nt)).reshape(ns + nt, 1)

    num_classes = enc["w2"].shape[1]
    kernel = functools.partial(_deal_fused_kernel,
                               num_src=ns, num_classes=num_classes)

    # TODO(synk): for production CDAN shapes (C~100s, F~300, H~1024, big batch)
    # stream ad W1 [C*F, H] with a class-chunk grid axis + VMEM accumulator
    # (v7x has only 64 MiB VMEM/TC), add a "parallel" batch grid axis so v7x's
    # two TensorCores split the work, and flip MXU_DTYPE to bfloat16.
    tloss, closs = pl.pallas_call(
        kernel,
        out_shape=(jax.ShapeDtypeStruct((1, 1), jnp.float32),
                   jax.ShapeDtypeStruct((1, 1), jnp.float32)),
        in_specs=_vmem_specs(10),
        out_specs=tuple(_vmem_specs(2)),
    )(x_cat, labels,
      enc["w1"], enc["b1"], enc["w2"], enc["b2"],
      ad["w1"], ad["b1"], ad["w2"], ad["b2"])
    return tloss[0, 0], closs[0, 0]


def init_params(key, d_in, emb_dim, num_classes, ad_hidden,
                projection_hidden_size, projection_size):
    ks = jax.random.split(key, 8)

    def lin(k, fan_in, fan_out):
        kw, kb = jax.random.split(k)
        scale = 1.0 / math.sqrt(fan_in)
        w = jax.random.uniform(kw, (fan_in, fan_out), jnp.float32, -scale, scale)
        b = jax.random.uniform(kb, (1, fan_out), jnp.float32, -scale, scale)
        return w, b

    ew1, eb1 = lin(ks[0], d_in, emb_dim)
    ew2, eb2 = lin(ks[1], emb_dim, num_classes)
    # ad-net W1 rows are indexed by (class * emb_dim + feature), matching the
    # PyTorch view(-1, C*F) flattening of bmm(softmax.unsqueeze(2), feat.unsqueeze(1)).
    aw1, ab1 = lin(ks[2], num_classes * emb_dim, ad_hidden)
    aw2, ab2 = lin(ks[3], ad_hidden, 1)

    # online_projector / predictor MLPs from DEAL.__init__ (used only by
    # DEAL.embed(), not by forward()); initialized for parameter parity.
    pw1, pb1 = lin(ks[4], emb_dim, projection_hidden_size)
    pw2, pb2 = lin(ks[5], projection_hidden_size, projection_size)
    qw1, qb1 = lin(ks[6], projection_size, projection_hidden_size)
    qw2, qb2 = lin(ks[7], projection_hidden_size, num_classes)

    return {
        "encoder": {"w1": ew1, "b1": eb1, "w2": ew2, "b2": eb2},
        "ad_net": {"w1": aw1, "b1": ab1, "w2": aw2, "b2": ab2},
        "online_projector": {"w1": pw1, "b1": pb1, "w2": pw2, "b2": pb2,
                             "bn_gamma": jnp.ones((projection_hidden_size,)),
                             "bn_beta": jnp.zeros((projection_hidden_size,))},
        "predictor": {"w1": qw1, "b1": qb1, "w2": qw2, "b2": qb2,
                      "bn_gamma": jnp.ones((projection_hidden_size,)),
                      "bn_beta": jnp.zeros((projection_hidden_size,))},
    }


if __name__ == "__main__":
    # Small, forward-consistent shapes; F and H chosen lane-aligned (x128) so
    # features / ad-net activations and the C*F outer product are lane-dense.
    NS, NT = 4, 4          # source / target batch sizes  -> B = 8 (one sublane group)
    D_IN = 16              # raw input feature dim fed to the encoder
    EMB_DIM = 128          # encoder feature dim (emb_dim), lane-aligned
    NUM_CLASSES = 2        # prediction_size
    AD_HIDDEN = 128        # adversarial net hidden size, lane-aligned
    PROJ_HIDDEN = 64       # projection_hidden_size (scaled down)
    PROJ_SIZE = 32         # projection_size (scaled down)

    key = jax.random.PRNGKey(0)
    k_par, k_src, k_tgt, k_lab = jax.random.split(key, 4)

    params = init_params(k_par, D_IN, EMB_DIM, NUM_CLASSES, AD_HIDDEN,
                         PROJ_HIDDEN, PROJ_SIZE)
    source_x = jax.random.normal(k_src, (NS, D_IN), jnp.float32)
    target_x = jax.random.normal(k_tgt, (NT, D_IN), jnp.float32)
    source_y = jax.random.randint(k_lab, (NS,), 0, NUM_CLASSES, jnp.int32)

    fwd = jax.jit(functools.partial(deal_forward, iter_num=100))
    transfer_loss, classifier_loss = fwd(params, source_x, source_y, target_x)
    jax.block_until_ready((transfer_loss, classifier_loss))

    assert jnp.isfinite(transfer_loss) and jnp.isfinite(classifier_loss)
    print("KERNEL_OK")
</pallas_src>

<mosaic_0001>
module attributes {stable_mosaic.version = 11 : i64} {
  func.func @_deal_fused_kernel(%arg0: memref<8x16xf32, #tpu.memory_space<vmem>>, %arg1: memref<8x1xi32, #tpu.memory_space<vmem>>, %arg2: memref<16x128xf32, #tpu.memory_space<vmem>>, %arg3: memref<1x128xf32, #tpu.memory_space<vmem>>, %arg4: memref<128x2xf32, #tpu.memory_space<vmem>>, %arg5: memref<1x2xf32, #tpu.memory_space<vmem>>, %arg6: memref<256x128xf32, #tpu.memory_space<vmem>>, %arg7: memref<1x128xf32, #tpu.memory_space<vmem>>, %arg8: memref<128x1xf32, #tpu.memory_space<vmem>>, %arg9: memref<1x1xf32, #tpu.memory_space<vmem>>, %arg10: memref<1x1xf32, #tpu.memory_space<vmem>>, %arg11: memref<1x1xf32, #tpu.memory_space<vmem>>) attributes {dimension_semantics = [], scalar_prefetch = 0 : i64, scratch_operands = 0 : i64, tpu.core_type = #tpu.core_type<tc>} {
    %c0 = arith.constant 0 : index
    %c0_0 = arith.constant 0 : index
    %0 = vector.load %arg0[%c0, %c0_0] : memref<8x16xf32, #tpu.memory_space<vmem>>, vector<8x16xf32>
    %c0_1 = arith.constant 0 : index
    %c0_2 = arith.constant 0 : index
    %1 = vector.load %arg2[%c0_1, %c0_2] : memref<16x128xf32, #tpu.memory_space<vmem>>, vector<16x128xf32>
    %cst = arith.constant dense<0.000000e+00> : vector<8x128xf32>
    %2 = tpu.matmul %0, %1, %cst {dimension_numbers = #tpu.dot_dimension_numbers<[1], [0], [0], [1], [0, 0, 1, 1], [], []>} : vector<8x16xf32>, vector<16x128xf32>, vector<8x128xf32> -> vector<8x128xf32>
    %c0_3 = arith.constant 0 : index
    %c0_4 = arith.constant 0 : index
    %3 = vector.load %arg3[%c0_3, %c0_4] : memref<1x128xf32, #tpu.memory_space<vmem>>, vector<1x128xf32>
    %4 = vector.broadcast %3 : vector<1x128xf32> to vector<8x128xf32>
    %5 = arith.addf %2, %4 : vector<8x128xf32>
    %cst_5 = arith.constant 0.000000e+00 : f32
    %6 = vector.broadcast %cst_5 : f32 to vector<8x128xf32>
    %7 = arith.maximumf %5, %6 : vector<8x128xf32>
    %c0_6 = arith.constant 0 : index
    %c0_7 = arith.constant 0 : index
    %8 = vector.load %arg4[%c0_6, %c0_7] : memref<128x2xf32, #tpu.memory_space<vmem>>, vector<128x2xf32>
    %cst_8 = arith.constant dense<0.000000e+00> : vector<8x2xf32>
    %9 = tpu.matmul %7, %8, %cst_8 {dimension_numbers = #tpu.dot_dimension_numbers<[1], [0], [0], [1], [0, 0, 1, 1], [], []>} : vector<8x128xf32>, vector<128x2xf32>, vector<8x2xf32> -> vector<8x2xf32>
    %c0_9 = arith.constant 0 : index
    %c0_10 = arith.constant 0 : index
    %10 = vector.load %arg5[%c0_9, %c0_10] : memref<1x2xf32, #tpu.memory_space<vmem>>, vector<1x2xf32>
    %11 = vector.broadcast %10 : vector<1x2xf32> to vector<8x2xf32>
    %12 = arith.addf %9, %11 : vector<8x2xf32>
    %cst_11 = arith.constant dense<0xFF800000> : vector<8xf32>
    %13 = vector.multi_reduction <maximumf>, %12, %cst_11 [1] : vector<8x2xf32> to vector<8xf32>
    %14 = vector.shape_cast %13 : vector<8xf32> to vector<8x1xf32>
    %15 = vector.broadcast %14 : vector<8x1xf32> to vector<8x2xf32>
    %16 = arith.subf %12, %15 : vector<8x2xf32>
    %17 = math.exp %16 : vector<8x2xf32>
    %cst_12 = arith.constant dense<0.000000e+00> : vector<8xf32>
    %18 = vector.multi_reduction <add>, %17, %cst_12 [1] : vector<8x2xf32> to vector<8xf32>
    %19 = vector.shape_cast %18 : vector<8xf32> to vector<8x1xf32>
    %20 = vector.broadcast %19 : vector<8x1xf32> to vector<8x2xf32>
    %21 = arith.divf %17, %20 : vector<8x2xf32>
    %cst_13 = arith.constant 9.99999974E-6 : f32
    %22 = vector.broadcast %cst_13 : f32 to vector<8x2xf32>
    %23 = arith.addf %21, %22 : vector<8x2xf32>
    %24 = math.log %23 : vector<8x2xf32>
    %25 = arith.mulf %21, %24 : vector<8x2xf32>
    %cst_14 = arith.constant dense<0.000000e+00> : vector<8xf32>
    %26 = vector.multi_reduction <add>, %25, %cst_14 [1] : vector<8x2xf32> to vector<8xf32>
    %27 = vector.shape_cast %26 : vector<8xf32> to vector<8x1xf32>
    %cst_15 = arith.constant 0.000000e+00 : f32
    %28 = vector.broadcast %cst_15 : f32 to vector<8x1xf32>
    %29 = arith.subf %28, %27 : vector<8x1xf32>
    %30 = vector.extract_strided_slice %21 {offsets = [0, 0], sizes = [8, 1], strides = [1, 1]} : vector<8x2xf32> to vector<8x1xf32>
    %31 = vector.broadcast %30 : vector<8x1xf32> to vector<8x128xf32>
    %32 = arith.mulf %31, %7 : vector<8x128xf32>
    %33 = vector.extract_strided_slice %21 {offsets = [0, 1], sizes = [8, 1], strides = [1, 1]} : vector<8x2xf32> to vector<8x1xf32>
    %34 = vector.broadcast %33 : vector<8x1xf32> to vector<8x128xf32>
    %35 = arith.mulf %34, %7 : vector<8x128xf32>
    %36 = tpu.concatenate %32, %35 in 1 : vector<8x128xf32>, vector<8x128xf32> -> vector<8x256xf32>
    %c0_16 = arith.constant 0 : index
    %c0_17 = arith.constant 0 : index
    %37 = vector.load %arg6[%c0_16, %c0_17] : memref<256x128xf32, #tpu.memory_space<vmem>>, vector<256x128xf32>
    %cst_18 = arith.constant dense<0.000000e+00> : vector<8x128xf32>
    %38 = tpu.matmul %36, %37, %cst_18 {dimension_numbers = #tpu.dot_dimension_numbers<[1], [0], [0], [1], [0, 0, 1, 1], [], []>} : vector<8x256xf32>, vector<256x128xf32>, vector<8x128xf32> -> vector<8x128xf32>
    %c0_19 = arith.constant 0 : index
    %c0_20 = arith.constant 0 : index
    %39 = vector.load %arg7[%c0_19, %c0_20] : memref<1x128xf32, #tpu.memory_space<vmem>>, vector<1x128xf32>
    %40 = vector.broadcast %39 : vector<1x128xf32> to vector<8x128xf32>
    %41 = arith.addf %38, %40 : vector<8x128xf32>
    %cst_21 = arith.constant 0.000000e+00 : f32
    %42 = vector.broadcast %cst_21 : f32 to vector<8x128xf32>
    %43 = arith.maximumf %41, %42 : vector<8x128xf32>
    %c0_22 = arith.constant 0 : index
    %c0_23 = arith.constant 0 : index
    %44 = vector.load %arg8[%c0_22, %c0_23] : memref<128x1xf32, #tpu.memory_space<vmem>>, vector<128x1xf32>
    %cst_24 = arith.constant dense<0.000000e+00> : vector<8x1xf32>
    %45 = tpu.matmul %43, %44, %cst_24 {dimension_numbers = #tpu.dot_dimension_numbers<[1], [0], [0], [1], [0, 0, 1, 1], [], []>} : vector<8x128xf32>, vector<128x1xf32>, vector<8x1xf32> -> vector<8x1xf32>
    %c0_25 = arith.constant 0 : index
    %c0_26 = arith.constant 0 : index
    %46 = vector.load %arg9[%c0_25, %c0_26] : memref<1x1xf32, #tpu.memory_space<vmem>>, vector<1x1xf32>
    %47 = vector.broadcast %46 : vector<1x1xf32> to vector<8x1xf32>
    %48 = arith.addf %45, %47 : vector<8x1xf32>
    %49 = tpu.iota {dimensions = array<i32: 0>} : vector<8x1xi32>
    %c4_i32 = arith.constant 4 : i32
    %50 = vector.broadcast %c4_i32 : i32 to vector<8x1xi32>
    %51 = arith.cmpi slt, %49, %50 : vector<8x1xi32>
    %52 = arith.extui %51 : vector<8x1xi1> to vector<8x1xi32>
    %53 = arith.sitofp %52 : vector<8x1xi32> to vector<8x1xf32>
    %c4_i32_27 = arith.constant 4 : i32
    %54 = vector.broadcast %c4_i32_27 : i32 to vector<8x1xi32>
    %55 = arith.cmpi slt, %49, %54 : vector<8x1xi32>
    %56 = arith.extui %55 : vector<8x1xi1> to vector<8x1xi32>
    %57 = arith.sitofp %56 : vector<8x1xi32> to vector<8x1xf32>
    %cst_28 = arith.constant 0.000000e+00 : f32
    %58 = vector.broadcast %cst_28 : f32 to vector<8x1xf32>
    %59 = arith.subf %58, %29 : vector<8x1xf32>
    %60 = math.exp %59 : vector<8x1xf32>
    %cst_29 = arith.constant 1.000000e+00 : f32
    %61 = vector.broadcast %cst_29 : f32 to vector<8x1xf32>
    %62 = arith.addf %61, %60 : vector<8x1xf32>
    %63 = arith.mulf %62, %57 : vector<8x1xf32>
    %cst_30 = arith.constant 1.000000e+00 : f32
    %64 = vector.broadcast %cst_30 : f32 to vector<8x1xf32>
    %65 = arith.subf %64, %57 : vector<8x1xf32>
    %66 = arith.mulf %62, %65 : vector<8x1xf32>
    %67 = vector.shape_cast %63 : vector<8x1xf32> to vector<1x8x1xf32>
    %cst_31 = arith.constant dense<0.000000e+00> : vector<1xf32>
    %68 = vector.multi_reduction <add>, %67, %cst_31 [1, 2] : vector<1x8x1xf32> to vector<1xf32>
    %69 = vector.shape_cast %68 : vector<1xf32> to vector<1x1x1xf32>
    %70 = vector.extract %69[0, 0, 0] : f32 from vector<1x1x1xf32>
    %71 = vector.broadcast %70 : f32 to vector<1x1xf32>
    %72 = vector.shape_cast %66 : vector<8x1xf32> to vector<1x8x1xf32>
    %cst_32 = arith.constant dense<0.000000e+00> : vector<1xf32>
    %73 = vector.multi_reduction <add>, %72, %cst_32 [1, 2] : vector<1x8x1xf32> to vector<1xf32>
    %74 = vector.shape_cast %73 : vector<1xf32> to vector<1x1x1xf32>
    %75 = vector.extract %74[0, 0, 0] : f32 from vector<1x1x1xf32>
    %76 = vector.broadcast %75 : f32 to vector<1x1xf32>
    %77 = vector.broadcast %71 : vector<1x1xf32> to vector<8x1xf32>
    %78 = arith.divf %63, %77 : vector<8x1xf32>
    %79 = vector.broadcast %76 : vector<1x1xf32> to vector<8x1xf32>
    %80 = arith.divf %66, %79 : vector<8x1xf32>
    %81 = arith.addf %78, %80 : vector<8x1xf32>
    %cst_33 = arith.constant 0.000000e+00 : f32
    %82 = vector.broadcast %cst_33 : f32 to vector<8x1xf32>
    %83 = arith.maximumf %48, %82 : vector<8x1xf32>
    %84 = math.absf %48 : vector<8x1xf32>
    %cst_34 = arith.constant 0.000000e+00 : f32
    %85 = vector.broadcast %cst_34 : f32 to vector<8x1xf32>
    %86 = arith.subf %85, %84 : vector<8x1xf32>
    %87 = math.exp %86 : vector<8x1xf32>
    %cst_35 = arith.constant 1.000000e+00 : f32
    %88 = vector.broadcast %cst_35 : f32 to vector<8x1xf32>
    %89 = arith.addf %88, %87 : vector<8x1xf32>
    %90 = math.log %89 : vector<8x1xf32>
    %91 = arith.addf %83, %90 : vector<8x1xf32>
    %92 = arith.mulf %53, %48 : vector<8x1xf32>
    %93 = arith.subf %91, %92 : vector<8x1xf32>
    %94 = arith.mulf %81, %93 : vector<8x1xf32>
    %95 = vector.shape_cast %94 : vector<8x1xf32> to vector<1x8x1xf32>
    %cst_36 = arith.constant dense<0.000000e+00> : vector<1xf32>
    %96 = vector.multi_reduction <add>, %95, %cst_36 [1, 2] : vector<1x8x1xf32> to vector<1xf32>
    %97 = vector.shape_cast %96 : vector<1xf32> to vector<1x1x1xf32>
    %98 = vector.extract %97[0, 0, 0] : f32 from vector<1x1x1xf32>
    %99 = vector.broadcast %98 : f32 to vector<1x1xf32>
    %100 = vector.shape_cast %81 : vector<8x1xf32> to vector<1x8x1xf32>
    %cst_37 = arith.constant dense<0.000000e+00> : vector<1xf32>
    %101 = vector.multi_reduction <add>, %100, %cst_37 [1, 2] : vector<1x8x1xf32> to vector<1xf32>
    %102 = vector.shape_cast %101 : vector<1xf32> to vector<1x1x1xf32>
    %103 = vector.extract %102[0, 0, 0] : f32 from vector<1x1x1xf32>
    %104 = vector.broadcast %103 : f32 to vector<1x1xf32>
    %105 = arith.divf %99, %104 : vector<1x1xf32>
    %c0_38 = arith.constant 0 : index
    %c0_39 = arith.constant 0 : index
    %106 = vector.load %arg10[%c0_38, %c0_39] : memref<1x1xf32, #tpu.memory_space<vmem>>, vector<1x1xf32>
    tpu.vector_store %arg10[%c0_38, %c0_39], %105 {strides = array<i32>} : memref<1x1xf32, #tpu.memory_space<vmem>>, vector<1x1xf32>,
    %c0_40 = arith.constant 0 : index
    %c0_41 = arith.constant 0 : index
    %107 = vector.load %arg1[%c0_40, %c0_41] : memref<8x1xi32, #tpu.memory_space<vmem>>, vector<8x1xi32>
    %108 = tpu.iota {dimensions = array<i32: 1>} : vector<8x2xi32>
    %109 = vector.broadcast %107 : vector<8x1xi32> to vector<8x2xi32>
    %110 = arith.cmpi eq, %108, %109 : vector<8x2xi32>
    %111 = arith.extui %110 : vector<8x2xi1> to vector<8x2xi32>
    %112 = arith.sitofp %111 : vector<8x2xi32> to vector<8x2xf32>
    %113 = math.log %19 : vector<8x1xf32>
    %114 = arith.addf %14, %113 : vector<8x1xf32>
    %115 = arith.mulf %12, %112 : vector<8x2xf32>
    %cst_42 = arith.constant dense<0.000000e+00> : vector<8xf32>
    %116 = vector.multi_reduction <add>, %115, %cst_42 [1] : vector<8x2xf32> to vector<8xf32>
    %117 = vector.shape_cast %116 : vector<8xf32> to vector<8x1xf32>
    %118 = arith.subf %114, %117 : vector<8x1xf32>
    %119 = arith.mulf %118, %53 : vector<8x1xf32>
    %120 = vector.shape_cast %119 : vector<8x1xf32> to vector<1x8x1xf32>
    %cst_43 = arith.constant dense<0.000000e+00> : vector<1xf32>
    %121 = vector.multi_reduction <add>, %120, %cst_43 [1, 2] : vector<1x8x1xf32> to vector<1xf32>
    %122 = vector.shape_cast %121 : vector<1xf32> to vector<1x1x1xf32>
    %123 = vector.extract %122[0, 0, 0] : f32 from vector<1x1x1xf32>
    %124 = vector.broadcast %123 : f32 to vector<1x1xf32>
    %cst_44 = arith.constant 4.000000e+00 : f32
    %125 = vector.broadcast %cst_44 : f32 to vector<1x1xf32>
    %126 = arith.divf %124, %125 : vector<1x1xf32>
    %c0_45 = arith.constant 0 : index
    %c0_46 = arith.constant 0 : index
    %127 = vector.load %arg11[%c0_45, %c0_46] : memref<1x1xf32, #tpu.memory_space<vmem>>, vector<1x1xf32>
    tpu.vector_store %arg11[%c0_45, %c0_46], %126 {strides = array<i32>} : memref<1x1xf32, #tpu.memory_space<vmem>>, vector<1x1xf32>,
    return
  }
}

</mosaic_0001>

<bundles_post_ra>
// kernel: deal_forward.1
= control target key start
LH: loop header
LB: loop body
LE: loop exit
PB: predicated region body
PF: predicated region fallthrough
CT: control target
= control target key end

     0   :  { %s1209_s0 = inlined_call_operand.vmem [shape: f32[8,16], index: 0, kind: input, shape index: {}]   ;;  %s1210_s1 = inlined_call_operand.vmem [shape: s32[8,1], index: 1, kind: input, shape index: {}]   ;;  %s1211_s2 = inlined_call_operand.vmem [shape: f32[16,128], index: 2, kind: input, shape index: {}]   ;;  %s1212_s3 = inlined_call_operand.vmem [shape: f32[1,128], index: 3, kind: input, shape index: {}]   ;;  %s1213_s4 = inlined_call_operand.vmem [shape: f32[128,2], index: 4, kind: input, shape index: {}]   ;;  %s1214_s5 = inlined_call_operand.vmem [shape: f32[1,2], index: 5, kind: input, shape index: {}]   ;;  %s1215_s6 = inlined_call_operand.vmem [shape: f32[256,128], index: 6, kind: input, shape index: {}]   ;;  %s1216_s7 = inlined_call_operand.vmem [shape: f32[1,128], index: 7, kind: input, shape index: {}]   ;;  %s1217_s8 = inlined_call_operand.vmem [shape: f32[128,1], index: 8, kind: input, shape index: {}]   ;;  %s1218_s9 = inlined_call_operand.<no memory space> [shape: f32[1,1], index: 9, kind: input, shape index: {}]   ;;  %s1219_s10 = inlined_call_operand.hbm [shape: f32[1,1], index: 10, kind: output, shape index: {0}]   ;;  %s1220_s11 = inlined_call_operand.hbm [shape: f32[1,1], index: 11, kind: output, shape index: {1}]  }
   0x1   :  { %v17_v0 = vstv %s1218_s9 }
   0x2   :  { %18 = vst [vmem:[#allocation2] sm:$0x1] %v17_v0 }
   0x3   :  { %19 = vsyncpa [#allocation4], 0  ;;  %v43_v1 = vld [vmem:[%s1211_s2 + $0x8] sm:$0xff]  ;;  %v830_v2 = vmov 0.0   ;;  %v42_v3 = vld [vmem:[%s1211_s2] sm:$0xff]  ;;  %vm831_vm0 = vmmov 0  }
   0x4   :  { %670 = vmatprep.subr.mxu0 %v830_v2  ;;  %674 = vmatprep.mubr.msk.f32.mxu0 %vm831_vm0, %v830_v2  ;;  %v141_v4 = vld [vmem:[%s1213_s4 + $0x78] sm:$0xff]  ;;  %v41_v5 = vld [vmem:[%s1209_s0] sm:$0xff]  ;;  %vm51_vm1 = vcmask 130048   ;;  %v140_v6 = vld [vmem:[%s1213_s4 + $0x70] sm:$0xff] }
   0x5   :  { %671 = vmatpush3.msra.mxu0 %v43_v1  ;;  %677 = vmatprep.subr.mxu1 %v830_v2  ;;  %v139_v7 = vld [vmem:[%s1213_s4 + $0x68] sm:$0xff] }
   0x6   :  { %672 = vmatprep.subr.mxu0 %v830_v2  ;;  %678 = vmatpush3.msra.mxu1 %v141_v4 }
   0x7   :  { %673 = vmatpush3.msra.mxu0 %v42_v3  ;;  %679 = vmatprep.subr.mxu1 %v830_v2 }
   0x8   :  { %675 = vmatmul.mubr.msk.f32.vlgmr.msra.gmra.mxu0 %vm51_vm1, %v41_v5  ;;  %680 = vmatpush3.msra.mxu1 %v140_v6 }
   0x9   :  { %20 = vsyncpa [#allocation6], 0  ;;  %681 = vmatprep.subr.mxu1 %v830_v2  ;;  %v138_v8 = vld [vmem:[%s1213_s4 + $0x60] sm:$0xff]  ;;  %709 = vmatprep.mubr.msk.f32.mxu1 %vm831_vm0, %v830_v2  ;;  %v137_v9 = vld [vmem:[%s1213_s4 + $0x58] sm:$0xff]  ;;  %vm219_vm2 = vcmask 15360   ;;  %v832_v36 = vmov 1  }
   0xa   :  { %682 = vmatpush3.msra.mxu1 %v139_v7  ;;  %v136_v10 = vld [vmem:[%s1213_s4 + $0x50] sm:$0xff]  ;;  %v135_v11 = vld [vmem:[%s1213_s4 + $0x48] sm:$0xff]  ;;  %v134_v12 = vld [vmem:[%s1213_s4 + $0x40] sm:$0xff]  ;;  %763 = vset.pattern.permute.xlu1 %v832_v36  ;;  %v833_v37 = vmov 0   ;;  %vm465_vm4 = vcmask 7168   ;;  %s834_s16 = smov [#allocation5]  }
   0xb   :  { %683 = vmatprep.subr.mxu1 %v830_v2  ;;  %v133_v13 = vld [vmem:[%s1213_s4 + $0x38] sm:$0xff]  ;;  %v132_v14 = vld [vmem:[%s1213_s4 + $0x30] sm:$0xff]  ;;  %v131_v15 = vld [vmem:[%s1213_s4 + $0x28] sm:$0xff]  ;;  %765 = vset.pattern.permute.xlu0 %v833_v37  ;;  %vm529_vm6 = vcmask 0  }
   0xc   :  { %684 = vmatpush3.msra.mxu1 %v138_v8  ;;  %v130_v16 = vld [vmem:[%s1213_s4 + $0x20] sm:$0xff]  ;;  %v129_v17 = vld [vmem:[%s1213_s4 + $0x18] sm:$0xff]  ;;  %v128_v18 = vld [vmem:[%s1213_s4 + $0x10] sm:$0xff] }
   0xd   :  { %685 = vmatprep.subr.mxu1 %v830_v2  ;;  %v127_v19 = vld [vmem:[%s1213_s4 + $0x8] sm:$0xff]  ;;  %v126_v20 = vld [vmem:[%s1213_s4] sm:$0xff]  ;;  %v281_v38 = vld [vmem:[%s1215_s6 + $0xf8] sm:$0xff] }
   0xe   :  { %686 = vmatpush3.msra.mxu1 %v137_v9  ;;  %v591_v21 = vld [vmem:[%s1212_s3] ss:$0 sm:$0xff]  ;;  %v265_v39 = vld [vmem:[%s1215_s6 + $0x78] sm:$0xff]  ;;  %v280_v40 = vld [vmem:[%s1215_s6 + $0xf0] sm:$0xff]  ;;  %618 = vmatprep.subr.mxu0 %v281_v38  ;;  %s579_s3 = sshll.u32 %s834_s16, 4  ;;  %s580_s3 = int_to_ptr.vmem [resolvable:$true] %s579_s3 }
   0xf   :  { %687 = vmatprep.subr.mxu1 %v830_v2  ;;  %v593_v26 = vld [vmem:[%s1214_s5] ss:$0 sm:$0xff]  ;;  %v264_v41 = vld [vmem:[%s1215_s6 + $0x70] sm:$0xff]  ;;  %619 = vmatpush3.msra.mxu0 %v265_v39  ;;  %v279_v42 = vld [vmem:[%s1215_s6 + $0xe8] sm:$0xff]  ;;  %s786_s5 = scalar_lea.vmem %s580_s3, 16  ;;  %s790_s17 = scalar_lea.vmem %s580_s3, 32 }
  0x10   :  { %688 = vmatpush3.msra.mxu1 %v136_v10  ;;  %620 = vmatprep.subr.mxu0 %v280_v40  ;;  %v263_v43 = vld [vmem:[%s1215_s6 + $0x68] sm:$0xff]  ;;  %v278_v44 = vld [vmem:[%s1215_s6 + $0xe0] sm:$0xff]  ;;  %v277_v46 = vld [vmem:[%s1215_s6 + $0xd8] sm:$0xff]  ;;  %p787_p0 = scmp.ne.s32.totalorder %s580_s3, %s786_s5  ;;  %p791_p1 = scmp.lt.s32.totalorder %s580_s3, %s580_s3 }
  0x11   :  { %689 = vmatprep.subr.mxu1 %v830_v2  ;;  %621 = vmatpush3.msra.mxu0 %v264_v41  ;;  %v262_v45 = vld [vmem:[%s1215_s6 + $0x60] sm:$0xff]  ;;  %v261_v47 = vld [vmem:[%s1215_s6 + $0x58] sm:$0xff]  ;;  %v276_v48 = vld [vmem:[%s1215_s6 + $0xd0] sm:$0xff]  ;;  %p792_p2 = scmp.lt.s32.totalorder %s790_s17, %s786_s5 }
  0x12   :  { %690 = vmatpush3.msra.mxu1 %v135_v11  ;;  %622 = vmatprep.subr.mxu0 %v279_v42  ;;  %v260_v49 = vld [vmem:[%s1215_s6 + $0x50] sm:$0xff]  ;;  %v275_v50 = vld [vmem:[%s1215_s6 + $0xc8] sm:$0xff]  ;;  %v274_v52 = vld [vmem:[%s1215_s6 + $0xc0] sm:$0xff] }
  0x13   :  { %691 = vmatprep.subr.mxu1 %v830_v2  ;;  %623 = vmatpush3.msra.mxu0 %v263_v43  ;;  %v259_v51 = vld [vmem:[%s1215_s6 + $0x48] sm:$0xff]  ;;  %v258_v53 = vld [vmem:[%s1215_s6 + $0x40] sm:$0xff]  ;;  %v273_v54 = vld [vmem:[%s1215_s6 + $0xb8] sm:$0xff]  ;;  %p793_p3 = por %p792_p2, %p791_p1 }
  0x14   :  { %692 = vmatpush3.msra.mxu1 %v134_v12  ;;  %624 = vmatprep.subr.mxu0 %v278_v44  ;;  %v257_v55 = vld [vmem:[%s1215_s6 + $0x38] sm:$0xff]  ;;  %v272_v56 = vld [vmem:[%s1215_s6 + $0xb0] sm:$0xff]  ;;  %v271_v58 = vld [vmem:[%s1215_s6 + $0xa8] sm:$0xff] }
  0x15   :  { %693 = vmatprep.subr.mxu1 %v830_v2  ;;  %625 = vmatpush3.msra.mxu0 %v262_v45  ;;  %v256_v57 = vld [vmem:[%s1215_s6 + $0x30] sm:$0xff]  ;;  %v255_v59 = vld [vmem:[%s1215_s6 + $0x28] sm:$0xff]  ;;  %v270_v60 = vld [vmem:[%s1215_s6 + $0xa0] sm:$0xff]  ;;  %p794_p4 = pnand %p793_p3, %p787_p0 }
  0x16   :  { %694 = vmatpush3.msra.mxu1 %v133_v13  ;;  %626 = vmatprep.subr.mxu0 %v277_v46  ;;  %v254_v61 = vld [vmem:[%s1215_s6 + $0x20] sm:$0xff]  ;;  %v269_v62 = vld [vmem:[%s1215_s6 + $0x98] sm:$0xff]  ;;  %v268_v1 = vld [vmem:[%s1215_s6 + $0x90] sm:$0xff] }
  0x17   :  { %695 = vmatprep.subr.mxu1 %v830_v2  ;;  %627 = vmatpush3.msra.mxu0 %v261_v47  ;;  %v253_v0 = vld [vmem:[%s1215_s6 + $0x18] sm:$0xff]  ;;  %v252_v3 = vld [vmem:[%s1215_s6 + $0x10] sm:$0xff]  ;;  %v267_v6 = vld [vmem:[%s1215_s6 + $0x88] sm:$0xff] }
  0x18   :  { %696 = vmatpush3.msra.mxu1 %v132_v14  ;;  %628 = vmatprep.subr.mxu0 %v276_v48  ;;  %v251_v7 = vld [vmem:[%s1215_s6 + $0x8] sm:$0xff]  ;;  %v266_v9 = vld [vmem:[%s1215_s6 + $0x80] sm:$0xff]  ;;  %v363_v47 = vld [vmem:[%s1217_s8 + $0x18] sm:$0xff] }
  0x19   :  { %697 = vmatprep.subr.mxu1 %v830_v2  ;;  %629 = vmatpush3.msra.mxu0 %v260_v49  ;;  %v250_v10 = vld [vmem:[%s1215_s6] sm:$0xff]  ;;  %v362_v48 = vld [vmem:[%s1217_s8 + $0x10] sm:$0xff]  ;;  %v361_v49 = vld [vmem:[%s1217_s8 + $0x8] sm:$0xff] }
  0x1a   :  { %698 = vmatpush3.msra.mxu1 %v131_v15  ;;  %630 = vmatprep.subr.mxu0 %v275_v50  ;;  %v375_v15 = vld [vmem:[%s1217_s8 + $0x78] sm:$0xff]  ;;  %v364_v46 = vld [vmem:[%s1217_s8 + $0x20] sm:$0xff] }
  0x1b   :  { %699 = vmatprep.subr.mxu1 %v830_v2  ;;  %631 = vmatpush3.msra.mxu0 %v259_v51  ;;  %v531_v50 = vld [vmem:[%s1210_s1] sm:$0xff] }
  0x1c   :  { %700 = vmatpush3.msra.mxu1 %v130_v16  ;;  %632 = vmatprep.subr.mxu0 %v274_v52  ;;  %v374_v16 = vld [vmem:[%s1217_s8 + $0x70] sm:$0xff]  ;;  %v360_v51 = vld [vmem:[%s1217_s8] sm:$0xff] }
  0x1d   :  { %701 = vmatprep.subr.mxu1 %v830_v2  ;;  %633 = vmatpush3.msra.mxu0 %v258_v53 }
  0x1e   :  { %702 = vmatpush3.msra.mxu1 %v129_v17  ;;  %634 = vmatprep.subr.mxu0 %v273_v54  ;;  %v373_v17 = vld [vmem:[%s1217_s8 + $0x68] sm:$0xff] }
  0x1f   :  { %703 = vmatprep.subr.mxu1 %v830_v2  ;;  %635 = vmatpush3.msra.mxu0 %v257_v55 }
  0x20   :  { %704 = vmatpush3.msra.mxu1 %v128_v18  ;;  %636 = vmatprep.subr.mxu0 %v272_v56  ;;  %v372_v18 = vld [vmem:[%s1217_s8 + $0x60] sm:$0xff] }
  0x21   :  { %705 = vmatprep.subr.mxu1 %v830_v2  ;;  %637 = vmatpush3.msra.mxu0 %v256_v57 }
  0x22   :  { %706 = vmatpush3.msra.mxu1 %v127_v19  ;;  %638 = vmatprep.subr.mxu0 %v271_v58  ;;  %v371_v19 = vld [vmem:[%s1217_s8 + $0x58] sm:$0xff] }
  0x23   :  { %707 = vmatprep.subr.mxu1 %v830_v2  ;;  %639 = vmatpush3.msra.mxu0 %v255_v59  ;;  %v594_v59 = vld [vmem:[%s1216_s7] ss:$0 sm:$0xff] }
  0x24   :  { %708 = vmatpush3.msra.mxu1 %v126_v20  ;;  %640 = vmatprep.subr.mxu0 %v270_v60  ;;  %v370_v20 = vld [vmem:[%s1217_s8 + $0x50] sm:$0xff] }
  0x25   :  { %712 = vmatprep.subr.mxu1 %v830_v2  ;;  %641 = vmatpush3.msra.mxu0 %v254_v61 }
  0x26   :  { %642 = vmatprep.subr.mxu0 %v269_v62 }
  0x27   :  { %643 = vmatpush3.msra.mxu0 %v253_v0 }
  0x28   :  { %644 = vmatprep.subr.mxu0 %v268_v1 }
  0x29   :  { %645 = vmatpush3.msra.mxu0 %v252_v3 }
  0x2a   :  { %646 = vmatprep.subr.mxu0 %v267_v6 }
  0x2b   :  { %647 = vmatpush3.msra.mxu0 %v251_v7 }
  0x2c   :  { %648 = vmatprep.subr.mxu0 %v266_v9 }
  0x2d   :  { %649 = vmatpush3.msra.mxu0 %v250_v10 }
  0xc8   :  { %v121_v22 = vpop.f32.mrf.mxu0 }
  0xc9   :  { %v122_v23 = vadd.f32 %v591_v21, %v121_v22  ;;  %v369_v21 = vld [vmem:[%s1217_s8 + $0x48] sm:$0xff]  ;;  %v368_v22 = vld [vmem:[%s1217_s8 + $0x40] sm:$0xff] }
  0xca   :  { %v676_v24 = vpop.f32.mrf.mxu0 }
  0xcb   :  { %v982_v25 = vmax.f32 %v122_v23, 0.0  ;;  %v367_v23 = vld [vmem:[%s1217_s8 + $0x38] sm:$0xff]  ;;  %v366_v24 = vld [vmem:[%s1217_s8 + $0x30] sm:$0xff] }
  0xcd   :  { %710 = vmatmul.mubr.f32.vlgmr.msra.gmra.mxu1 %v982_v25 }
  0xce   :  { %744 = vmatprep.mubr.msk.f32.mxu1 %vm831_vm0, %v830_v2  ;;  %713 = vmatpush3.msra.mxu1 %v375_v15  ;;  %v595_v15 = vld [vmem:[#allocation2] ss:$0 sm:$0xff] }
  0xcf   :  { %714 = vmatprep.subr.mxu1 %v830_v2 }
  0xd0   :  { %715 = vmatpush3.msra.mxu1 %v374_v16 }
  0xd1   :  { %716 = vmatprep.subr.mxu1 %v830_v2 }
  0xd2   :  { %717 = vmatpush3.msra.mxu1 %v373_v17 }
  0xd3   :  { %718 = vmatprep.subr.mxu1 %v830_v2 }
  0xd4   :  { %719 = vmatpush3.msra.mxu1 %v372_v18 }
  0xd5   :  { %720 = vmatprep.subr.mxu1 %v830_v2 }
  0xd6   :  { %721 = vmatpush3.msra.mxu1 %v371_v19 }
  0xd7   :  { %722 = vmatprep.subr.mxu1 %v830_v2 }
  0xd8   :  { %723 = vmatpush3.msra.mxu1 %v370_v20 }
  0xd9   :  { %724 = vmatprep.subr.mxu1 %v830_v2 }
  0xda   :  { %725 = vmatpush3.msra.mxu1 %v369_v21 }
  0xdb   :  { %726 = vmatprep.subr.mxu1 %v830_v2 }
  0xdc   :  { %727 = vmatpush3.msra.mxu1 %v368_v22 }
  0xdd   :  { %728 = vmatprep.subr.mxu1 %v830_v2 }
  0xde   :  { %729 = vmatpush3.msra.mxu1 %v367_v23 }
  0xdf   :  { %730 = vmatprep.subr.mxu1 %v830_v2 }
  0xe0   :  { %731 = vmatpush3.msra.mxu1 %v366_v24 }
  0xe1   :  { %732 = vmatprep.subr.mxu1 %v830_v2 }
 0x18d   :  { %v215_v27 = vpop.f32.mrf.mxu1 }
 0x18e   :  { %v990_v28 = vadd.f32 %v593_v26, %v215_v27  ;;  %v365_v26 = vld [vmem:[%s1217_s8 + $0x28] sm:$0xff] }
 0x18f   :  { %v711_v29 = vpop.f32.mrf.mxu1  ;;  %733 = vmatpush3.msra.mxu1 %v365_v26 }
 0x190   :  { %v220_v30 = vsel %vm219_vm2, %v990_v28, -inf  ;;  %734 = vmatprep.subr.mxu1 %v830_v2 }
 0x191   :  { %221 = vmax.xlane.f32.xlu0 %v220_v30  ;;  %735 = vmatpush3.msra.mxu1 %v364_v46 }
 0x192   :  { %736 = vmatprep.subr.mxu1 %v830_v2 }
 0x193   :  { %737 = vmatpush3.msra.mxu1 %v363_v47 }
 0x194   :  { %738 = vmatprep.subr.mxu1 %v830_v2 }
 0x195   :  { %739 = vmatpush3.msra.mxu1 %v362_v48 }
 0x196   :  { %740 = vmatprep.subr.mxu1 %v830_v2 }
 0x197   :  { %741 = vmatpush3.msra.mxu1 %v361_v49 }
 0x198   :  { %742 = vmatprep.subr.mxu1 %v830_v2 }
 0x199   :  { %743 = vmatpush3.msra.mxu1 %v360_v51 }
 0x21a   :  { %v994_v31 = vpop.xlane.xlu0 %221 }
 0x21b   :  { %v223_v32 = vsub.f32 %v990_v28, %v994_v31 }
 0x21d   :  { %v224_v33 = vmul.f32 1.442695, %v223_v32 }
 0x21f   :  { %766 = vpow2.f32 %v224_v33 }
 0x22c   :  { %v998_v34 = vpop.eup %766 }
 0x22d   :  { %v226_v35 = vsel %vm219_vm2, %v998_v34, 0.0 }
 0x22e   :  { %227 = vadd.xlane.f32.xlu0 %v226_v35 }
 0x2b7   :  { %v1078_v63 = vpop.xlane.xlu0 %227 }
 0x2b8   :  { %768 = vrcp.f32 %v1078_v63 }
 0x2c5   :  { %v769_v4 = vpop.eup %768 }
 0x2c6   :  { %v230_v5 = vmul.f32 %v769_v4, %v998_v34 }
 0x2c8   :  { %246 = vperm.xlu1 %763, %v230_v5   ;;  %v231_v8 = vadd.f32 1e-05, %v230_v5 }
 0x2ca   :  { %770 = vlog2.f32 %v231_v8 }
 0x2cc   :  { %764 = vset.pattern.permute.xlu1 %v833_v37  ;;  %v453_v37 = vlaneseq }
 0x2cd   :  { %241 = vperm.xlu1 %764, %v230_v5  }
 0x2ce   :  { %v454_v38 = vshrl.u32 %v453_v37, 7  ;;  %v533_v1 = vand.u32 127, %v453_v37 }
 0x2d0   :  { %vm455_vm3 = vcmp.lt.s32.totalorder %v454_v38, 4 }
 0x2d1   :  { %v1152_v39 = vsel %vm455_vm3, 1.0, %v830_v2 }
 0x2d2   :  { %v463_v40 = vsub.f32 1.0, %v1152_v39 }
 0x2d7   :  { %v771_v11 = vpop.eup %770 }
 0x2d8   :  { %v233_v12 = vmul.f32 0.6931472, %v771_v11 }
 0x2da   :  { %v234_v13 = vmul.f32 %v233_v12, %v230_v5 }
 0x2dc   :  { %v235_v14 = vsel %vm219_vm2, %v234_v13, 0.0 }
 0x2dd   :  { %236 = vadd.xlane.f32.xlu0 %v235_v14 }
 0x343   :  { %v247_v27 = vpop.permute.xlu1 %246 }
 0x344   :  { %v249_v29 = vmul.f32 %v247_v27, %v982_v25 }
 0x346   :  { %353 = vmatprep.mubr.f32.mxu0 %v249_v29 }
 0x348   :  { %v242_v30 = vpop.permute.xlu1 %241 }
 0x349   :  { %v244_v32 = vmul.f32 %v242_v30, %v982_v25 }
 0x34b   :  { %354 = vmatmul.mubr.f32.vlgmr.msra.gmra.mxu0 %v244_v32 }
 0x366   :  { %v237_v33 = vpop.xlane.xlu0 %236 }
 0x367   :  { %v238_v34 = vsub.f32 0.0, %v237_v33 }
 0x369   :  { %v458_v35 = vsub.f32 0.0, %v238_v34 }
 0x36b   :  { %v459_v36 = vmul.f32 1.442695, %v458_v35 }
 0x36d   :  { %772 = vpow2.f32 %v459_v36 }
 0x37a   :  { %v773_v41 = vpop.eup %772 }
 0x37b   :  { %v461_v42 = vadd.f32 1.0, %v773_v41 }
 0x37d   :  { %v1155_v43 = vmul.f32 %v463_v40, %v461_v42  ;;  %v1158_v25 = vmul.f32 %v1152_v39, %v461_v42 }
 0x37f   :  { %v476_v44 = vsel %vm465_vm4, %v1155_v43, 0.0  ;;  %v466_v45 = vsel %vm465_vm4, %v1158_v25, 0.0 }
 0x380   :  { %477 = vadd.xlane.f32.xlu0 %v476_v44  ;;  %467 = vadd.xlane.f32.xlu1 %v466_v45 }
 0x396   :  { %535 = vperm.xlu0 %765, %v531_v50  }
 0x409   :  { %v478_v52 = vpop.xlane.xlu0 %477  ;;  %v468_v53 = vpop.xlane.xlu1 %467 }
 0x40a   :  { %v479_v54 = vrot.slane %v478_v52, 4  ;;  %v469_v55 = vrot.slane %v468_v53, 4 }
 0x40b   :  { %v650_v56 = vpop.f32.mrf.mxu0 }
 0x40c   :  { %v480_v57 = vadd.f32 %v479_v54, %v478_v52  ;;  %v470_v58 = vadd.f32 %v469_v55, %v468_v53 }
 0x40d   :  { %v651_v60 = vpop.f32.mrf.mxu0 }
 0x40e   :  { %v481_v61 = vrot.slane %v480_v57, 2  ;;  %v471_v62 = vrot.slane %v470_v58, 2  ;;  %v652_v0 = vadd.f32 %v651_v60, %v650_v56 }
 0x410   :  { %v356_v3 = vadd.f32 %v652_v0, %v594_v59  ;;  %v472_v4 = vadd.f32 %v471_v62, %v470_v58  ;;  %v482_v5 = vadd.f32 %v481_v61, %v480_v57 }
 0x411   :  { %v536_v6 = vpop.permute.xlu0 %535 }
 0x412   :  { %v359_v7 = vmax.f32 %v356_v3, 0.0  ;;  %vm537_vm5 = vcmp.eq.s32.totalorder %v533_v1, %v536_v6  ;;  %v473_v8 = vrot.slane %v472_v4, 1  ;;  %v483_v9 = vrot.slane %v482_v5, 1 }
 0x413   :  { %v597_v10 = vsel %vm537_vm5, 1.0, %v830_v2 }
 0x414   :  { %745 = vmatmul.mubr.f32.vlgmr.msra.gmra.mxu1 %v359_v7  ;;  %v474_v11 = vadd.f32 %v473_v8, %v472_v4  ;;  %v484_v12 = vadd.f32 %v483_v9, %v482_v5  ;;  %v543_v13 = vmul.f32 %v597_v10, %v990_v28 }
 0x416   :  { %747 = vpush %v474_v11  ;;  %v544_v14 = vsel %vm219_vm2, %v543_v13, 0.0 }
 0x417   :  { %749 = vpush %v484_v12  ;;  %545 = vadd.xlane.f32.xlu1 %v544_v14 }
 0x447   :  { %s748_s1 = spop %747 }
 0x448   :  { %s750_s7 = spop %749  ;;  %v486_v2 = vstv %s748_s1 }
 0x449   :  { %v489_v22 = vstv %s750_s7 }
 0x4a0   :  { %v546_v41 = vpop.xlane.xlu1 %545 }
 0x4d4   :  { %v449_v16 = vpop.f32.mrf.mxu1 }
 0x4d5   :  { %v450_v17 = vadd.f32 %v595_v15, %v449_v16 }
 0x4d6   :  { %v746_v18 = vpop.f32.mrf.mxu1 }
 0x4d7   :  { %v494_v19 = vand.u32 2147483647, %v450_v17  ;;  %v493_v30 = vmax.f32 %v450_v17, 0.0  ;;  %v502_v36 = vmul.f32 %v1152_v39, %v450_v17 }
 0x4d9   :  { %v495_v20 = vsub.f32 0.0, %v494_v19 }
 0x4db   :  { %v496_v21 = vmul.f32 1.442695, %v495_v20 }
 0x4dd   :  { %774 = vpow2.f32 %v496_v21 }
 0x4de   :  { %776 = vrcp.f32 %v486_v2 }
 0x4df   :  { %778 = vrcp.f32 %v489_v22 }
 0x4e0   :  { %780 = vlog2.f32 %v1078_v63 }
 0x4ea   :  { %v775_v23 = vpop.eup %774 }
 0x4eb   :  { %v498_v28 = vadd.f32 1.0, %v775_v23  ;;  %v777_v24 = vpop.eup %776 }
 0x4ec   :  { %v779_v26 = vpop.eup %778  ;;  %v488_v32 = vmul.f32 %v777_v24, %v1158_v25 }
 0x4ed   :  { %782 = vlog2.f32 %v498_v28  ;;  %v781_v27 = vpop.eup %780  ;;  %v491_v33 = vmul.f32 %v779_v26, %v1155_v43 }
 0x4ee   :  { %v541_v35 = vmul.f32 0.6931472, %v781_v27 }
 0x4ef   :  { %v492_v38 = vadd.f32 %v491_v33, %v488_v32 }
 0x4f0   :  { %v542_v63 = vadd.f32 %v541_v35, %v994_v31 }
 0x4f1   :  { %v516_v46 = vsel %vm465_vm4, %v492_v38, 0.0 }
 0x4f2   :  { %v547_v44 = vsub.f32 %v542_v63, %v546_v41 }
 0x4f4   :  { %v548_v25 = vmul.f32 %v1152_v39, %v547_v44 }
 0x4f6   :  { %v549_v43 = vsel %vm465_vm4, %v548_v25, 0.0 }
 0x4fa   :  { %v783_v29 = vpop.eup %782 }
 0x4fb   :  { %v500_v34 = vmul.f32 0.6931472, %v783_v29 }
 0x4fd   :  { %v501_v37 = vadd.f32 %v500_v34, %v493_v30 }
 0x4ff   :  { %v503_v40 = vsub.f32 %v501_v37, %v502_v36 }
 0x501   :  { %v504_v42 = vmul.f32 %v503_v40, %v492_v38 }
 0x503   :  { %v505_v45 = vsel %vm465_vm4, %v504_v42, 0.0 }
 0x504   :  { %506 = vadd.xlane.f32.xlu1 %v505_v45 }
 0x508   :  { %517 = vadd.xlane.f32.xlu1 %v516_v46 }
 0x50c   :  { %550 = vadd.xlane.f32.xlu1 %v549_v43 }
 0x58d   :  { %v507_v47 = vpop.xlane.xlu1 %506 }
 0x58e   :  { %v508_v48 = vrot.slane %v507_v47, 4 }
 0x590   :  { %v509_v49 = vadd.f32 %v508_v48, %v507_v47 }
 0x591   :  { %v518_v50 = vpop.xlane.xlu1 %517 }
 0x592   :  { %v510_v51 = vrot.slane %v509_v49, 2  ;;  %v519_v52 = vrot.slane %v518_v50, 4 }
 0x594   :  { %v520_v31 = vadd.f32 %v519_v52, %v518_v50  ;;  %v511_v53 = vadd.f32 %v510_v51, %v509_v49 }
 0x595   :  { %v551_v54 = vpop.xlane.xlu1 %550 }
 0x596   :  { %v521_v55 = vrot.slane %v520_v31, 2  ;;  %v552_v56 = vrot.slane %v551_v54, 4  ;;  %v512_v57 = vrot.slane %v511_v53, 1 }
 0x598   :  { %v553_v58 = vadd.f32 %v552_v56, %v551_v54  ;;  %v513_v59 = vadd.f32 %v512_v57, %v511_v53  ;;  %v522_v60 = vadd.f32 %v521_v55, %v520_v31 }
 0x59a   :  { %v554_v39 = vrot.slane %v553_v58, 2  ;;  %751 = vpush %v513_v59  ;;  %v523_v61 = vrot.slane %v522_v60, 1 }
 0x59c   :  { %v555_v62 = vadd.f32 %v554_v39, %v553_v58  ;;  %v524_v0 = vadd.f32 %v523_v61, %v522_v60 }
 0x59e   :  { %753 = vpush %v524_v0  ;;  %v556_v1 = vrot.slane %v555_v62, 1 }
 0x5a0   :  { %v557_v3 = vadd.f32 %v556_v1, %v555_v62 }
 0x5a2   :  { %755 = vpush %v557_v3 }
 0x5cb   :  { %s752_s8 = spop %751 }
 0x5cf   :  { %s754_s15 = spop %753 }
 0x5d0   :  { %v526_v4 = vstv %s754_s15 }
 0x5d1   :  { %784 = vrcp.f32 %v526_v4 }
 0x5d3   :  { %s756_s4 = spop %755 }
 0x5d4   :  { %v559_v5 = vstv %s756_s4 }
 0x5d5   :  { %v561_v6 = vmul.f32 0.25, %v559_v5 }
 0x5d7   :  { %562 = vst.msk [vmem:[#allocation5] sm:$0x1] %vm529_vm6, %v561_v6 }
 0x5d8   :  { %797 = shalt.err (!%p794_p4)
}
 0x5d9   :  { %582 = dma.vmem_to_hbm [thread:$0]  %s580_s3, 16, %s1220_s11, [#allocation6]   ;;  %v515_v8 = vstv %s752_s8 }
 0x5da   :  { %s835_s20 = smov [#allocation3]  }
 0x5db   :  { %s569_s21 = sshll.u32 %s835_s20, 4  ;;  %s570_s21 = int_to_ptr.vmem [resolvable:$true] %s569_s21 }
 0x5dc   :  { %s806_s22 = scalar_lea.vmem %s570_s21, 16  ;;  %s810_s23 = scalar_lea.vmem %s570_s21, 32 }
 0x5dd   :  { %p807_p5 = scmp.ne.s32.totalorder %s570_s21, %s806_s22  ;;  %p811_p6 = scmp.lt.s32.totalorder %s570_s21, %s570_s21 }
 0x5de   :  { %v785_v7 = vpop.eup %784  ;;  %p812_p7 = scmp.lt.s32.totalorder %s810_s23, %s806_s22 }
 0x5df   :  { %v528_v9 = vmul.f32 %v785_v7, %v515_v8 }
 0x5e0   :  { %p813_p8 = por %p812_p7, %p811_p6 }
 0x5e1   :  { %530 = vst.msk [vmem:[#allocation3] sm:$0x1] %vm529_vm6, %v528_v9 }
 0x5e2   :  { %p814_p9 = pnand %p813_p8, %p807_p5 }
 0x5e4   :  { %817 = shalt.err (!%p814_p9)
}
 0x5e5   :  { %572 = dma.vmem_to_hbm [thread:$0]  %s570_s21, 16, %s1219_s10, [#allocation4]  }
 0x5e6   :  { %826 = dma.done.wait [#allocation4], 16  }
 0x5e7   :  { %827 = vsyncadd [#allocation4], 4294967280 }
 0x5e8   :  { %828 = dma.done.wait [#allocation6], 16  }
 0x5e9   :  { %829 = vsyncadd [#allocation6], 4294967280 }
 0x5ea   :  { %589 = vsyncpa [#allocation4], 1 }
 0x5eb   :  { %590 = vsyncpa [#allocation6], 1 }

</bundles_post_ra>
